<compile_context>
chip_gen: v5e
topology: v5e:2x2
jax: 0.10.0
libtpu: 0.0.40
codegen_flags: <defaults>
</compile_context>

<pallas_src>
import math
import numpy as np
import jax
import jax.numpy as jnp
from jax.experimental import pallas as pl
from jax.experimental.pallas import tpu as pltpu

LANE = 128


def _round_up(x, m):
    return ((x + m - 1) // m) * m


def _pad2(a, rows, cols):
    """Zero-pad a 2-D array to (rows, cols)."""
    a = jnp.asarray(a, jnp.float32)
    r, c = a.shape
    return jnp.zeros((rows, cols), jnp.float32).at[:r, :c].set(a)


def _exact_onehot_dot(onehot_bf16, data_f32):
    """(one-hot @ data) with a bf16 one-hot and a bf16 hi/lo split of the fp32 data.

    0/1 one-hots are exact in bf16; splitting the fp32 operand into bf16 hi + lo keeps the
    gather/scatter result within ~2^-18 of the exact fp32 value while the MXU only runs cheap
    bf16 passes (and the (E, N) one-hot costs half the VMEM of an fp32 one).  The 1/in-degree
    scaling is deliberately NOT folded in here (1/k is not exact in bf16)."""
    hi = data_f32.astype(jnp.bfloat16)
    lo = (data_f32 - hi.astype(jnp.float32)).astype(jnp.bfloat16)
    return (jnp.dot(onehot_bf16, hi, preferred_element_type=jnp.float32)
            + jnp.dot(onehot_bf16, lo, preferred_element_type=jnp.float32))


# ---------------------------------------------------------------------------
# Fused kernel — grid = (direction in {fmp, bmp}, topological level)
# ---------------------------------------------------------------------------
def _giph_fused_kernel(x_ref, w1_ref, b1_ref, w2_ref, b2_ref,
                       src_ref, dst_ref, scale_ref, recv_ref, ex_ref,
                       wpy_ref, wpe_ref, bp_ref, wu_ref, bu_ref, o_ref):
    """o_ref holds the resident node state y for the current direction (same output block
    across the level axis); all schedule/weight refs are resident across levels too."""
    lvl = pl.program_id(1)

    # --- level 0: fused node_transform  (FNN node_dim -> [node_dim] -> d) -----------------
    @pl.when(lvl == 0)
    def _():
        h = jnp.maximum(
            jnp.dot(x_ref[...], w1_ref[...], preferred_element_type=jnp.float32)
            + b1_ref[...], 0.0)
        o_ref[...] = (jnp.dot(h, w2_ref[...], preferred_element_type=jnp.float32)
                      + b2_ref[...])

    y = o_ref[...]                                   # (n_pad, D) resident node state
    n_pad = y.shape[0]
    e_pad = src_ref.shape[1]

    # --- gather y[edge_src]: bf16 one-hot built from the resident schedule indices ---------
    src_ids = src_ref[lvl]                           # (e_pad, 1); sentinel n_pad -> no match
    src_oh = (jax.lax.broadcasted_iota(jnp.int32, (e_pad, n_pad), 1)
              == src_ids).astype(jnp.bfloat16)
    y_src = _exact_onehot_dot(src_oh, y)             # (e_pad, D)

    # --- msg = relu(cat([y_src, e_x], 1) @ Wp + bp); Wp pre-split host-side ---------------
    msg = jnp.maximum(
        jnp.dot(y_src, wpy_ref[...], preferred_element_type=jnp.float32)
        + jnp.dot(ex_ref[lvl], wpe_ref[...], preferred_element_type=jnp.float32)
        + bp_ref[...], 0.0)                          # (e_pad, DD)

    # --- segment mean over destinations: bf16 scatter + fp32 per-node 1/in-degree ----------
    dst_ids = dst_ref[lvl]                           # (1, e_pad)
    dst_oh = (jax.lax.broadcasted_iota(jnp.int32, (n_pad, e_pad), 0)
              == dst_ids).astype(jnp.bfloat16)
    z = scale_ref[lvl] * _exact_onehot_dot(dst_oh, msg)   # (n_pad, DD)

    # --- residual node_update, masked by the precomputed frontier mask ---------------------
    upd = jnp.maximum(jnp.dot(z, wu_ref[...], preferred_element_type=jnp.float32)
                      + bu_ref[...], 0.0)
    o_ref[...] = y + recv_ref[lvl] * upd             # non-frontier rows unchanged


# ---------------------------------------------------------------------------
# Host-side schedule (built once per graph): topo levels -> static padded arrays
# ---------------------------------------------------------------------------
def _topo_levels(n, e_src, e_dst):
    indeg = [0] * n
    adj = [[] for _ in range(n)]
    for s, t in zip(e_src, e_dst):
        adj[int(s)].append(int(t))
        indeg[int(t)] += 1
    frontier = [i for i in range(n) if indeg[i] == 0]
    levels = []
    while frontier:
        levels.append(frontier)
        nxt = []
        for u in frontier:
            for v in adj[u]:
                indeg[v] -= 1
                if indeg[v] == 0:
                    nxt.append(v)
        frontier = nxt
    return levels


def build_schedule(n_nodes, src, dst):
    """Flatten dgl.prop_nodes_topo traversal (both directions) into padded index arrays.

    # TODO(synk): the data-dependent frontier traversal has no Pallas equivalent; it is
    # flattened once per graph on the host.  Batching several graphs into one call (extra
    # 'parallel' grid axis / block-diagonal schedule) is the next step for RL workloads.
    """
    src = np.asarray(src, np.int64)
    dst = np.asarray(dst, np.int64)
    num_e = len(src)

    per_dir = []
    for reverse in (False, True):
        e_src, e_dst = (dst, src) if reverse else (src, dst)
        levels = _topo_levels(n_nodes, e_src, e_dst)[1:]   # first frontier: no in-edges
        lvl_eidx = []
        for frontier in levels:
            fset = set(int(v) for v in frontier)
            lvl_eidx.append([j for j in range(num_e) if int(e_dst[j]) in fset])
        per_dir.append((e_src, e_dst, lvl_eidx))

    l_max = max(1, max(len(le) for (_, _, le) in per_dir))
    e_max = max([1] + [len(ei) for (_, _, le) in per_dir for ei in le])
    n_pad = _round_up(max(n_nodes, 8), 8)
    e_pad = _round_up(max(e_max, 8), 8)
    sent = n_pad                                      # node-id sentinel: outside iota range

    src_idx = np.full((2, l_max, e_pad, 1), sent, np.int32)
    dst_idx = np.full((2, l_max, 1, e_pad), sent, np.int32)
    scale = np.zeros((2, l_max, n_pad, 1), np.float32)      # 1/in-degree on frontier, else 0
    recv = np.zeros((2, l_max, n_pad, 1), np.float32)       # explicit frontier mask
    edge_id = np.full((2, l_max, e_pad), num_e, np.int32)   # sentinel -> appended zero row

    for di, (e_src, e_dst, lvl_eidx) in enumerate(per_dir):
        for li, eidx in enumerate(lvl_eidx):
            deg = {}
            for j in eidx:
                deg[int(e_dst[j])] = deg.get(int(e_dst[j]), 0) + 1
            for c, j in enumerate(eidx):
                src_idx[di, li, c, 0] = int(e_src[j])
                dst_idx[di, li, 0, c] = int(e_dst[j])
                edge_id[di, li, c] = j
            for v, k in deg.items():
                scale[di, li, v, 0] = 1.0 / float(k)
                recv[di, li, v, 0] = 1.0

    return dict(n_nodes=n_nodes, n_pad=n_pad, e_pad=e_pad, l_max=l_max,
                src=jnp.asarray(src_idx), dst=jnp.asarray(dst_idx),
                scale=jnp.asarray(scale), recv=jnp.asarray(recv),
                edge_id=jnp.asarray(edge_id))


# ---------------------------------------------------------------------------
# GiPHEmbedding.forward wrapper — ONE pallas_call for the whole forward pass
# ---------------------------------------------------------------------------
def giph_forward(node_x, edge_x, sched, params):
    n_nodes, n_pad = sched["n_nodes"], sched["n_pad"]
    e_pad, l_max = sched["e_pad"], sched["l_max"]
    node_dim = node_x.shape[1]
    edge_dim = edge_x.shape[1]
    d = params["nt"]["w2"].shape[1]

    # lane-dense (128-multiple) padded widths: full vregs, full MXU tiles, unmasked stores
    NDP = _round_up(node_dim, LANE)          # node feature / node_transform hidden width
    DP = _round_up(d, LANE)                  # per-direction embedding width (out_dim // 2)
    EDP = _round_up(edge_dim, LANE)          # edge feature width
    DDP = _round_up(d + edge_dim, LANE)      # pre_layer output width

    # node_transform params (shared by both directions), zero-padded lane-dense
    nt = params["nt"]
    x_pad = jnp.zeros((n_pad, NDP), jnp.float32).at[:n_nodes, :node_dim].set(node_x)
    w1 = _pad2(nt["w1"], NDP, NDP)
    b1 = _pad2(nt["b1"], 1, NDP)
    w2 = _pad2(nt["w2"], NDP, DP)
    b2 = _pad2(nt["b2"], 1, DP)

    # fmp / bmp params stacked on a leading direction axis; pre_layer weight pre-split into
    # node-state rows (:d) and edge-feature rows (d:) so both matmul operands are sublane-aligned.
    def stack(fn):
        return jnp.stack([fn(params["fmp"]), fn(params["bmp"])])
    wpy = stack(lambda p: _pad2(p["wp"][:d, :], DP, DDP))
    wpe = stack(lambda p: _pad2(p["wp"][d:, :], EDP, DDP))
    bp = stack(lambda p: _pad2(p["bp"], 1, DDP))
    wu = stack(lambda p: _pad2(p["wu"], DDP, DP))
    bu = stack(lambda p: _pad2(p["bu"], 1, DP))

    # per-level edge features; sentinel edge id selects an appended all-zero row so padded
    # edge slots stay exactly inert; lane-padded to EDP
    ex_ext = jnp.concatenate([jnp.asarray(edge_x, jnp.float32),
                              jnp.zeros((1, edge_dim), jnp.float32)], axis=0)
    ex = jnp.take(ex_ext, sched["edge_id"].reshape(-1), axis=0)
    ex = ex.reshape(2, l_max, e_pad, edge_dim)
    ex = jnp.zeros((2, l_max, e_pad, EDP), jnp.float32).at[..., :edge_dim].set(ex)

    # BlockSpecs: index_maps are constant over the level axis, so schedule and weights are
    # DMA'd once per direction and stay resident in VMEM for all l_max levels.
    def full2(a):
        return pl.BlockSpec(a.shape, lambda r, l: (0, 0))

    def per_dir3(a):
        return pl.BlockSpec((None,) + a.shape[1:], lambda r, l: (r, 0, 0))

    def per_dir4(a):
        return pl.BlockSpec((None,) + a.shape[1:], lambda r, l: (r, 0, 0, 0))

    out = pl.pallas_call(
        _giph_fused_kernel,
        out_shape=jax.ShapeDtypeStruct((2, n_pad, DP), jnp.float32),
        grid=(2, l_max),
        in_specs=[
            full2(x_pad), full2(w1), full2(b1), full2(w2), full2(b2),
            per_dir4(sched["src"]), per_dir4(sched["dst"]),
            per_dir4(sched["scale"]), per_dir4(sched["recv"]), per_dir4(ex),
            per_dir3(wpy), per_dir3(wpe), per_dir3(bp), per_dir3(wu), per_dir3(bu),
        ],
        out_specs=pl.BlockSpec((None, n_pad, DP), lambda r, l: (r, 0, 0)),
        # TODO(synk): on v7x switch the direction axis to pltpu.CORE_PARALLEL to put fmp/bmp on
        # the two TensorCores; plain "parallel" kept here since it is safe on all generations.
        compiler_params=pltpu.CompilerParams(
            dimension_semantics=("parallel", "arbitrary"),
            vmem_limit_bytes=32 * 1024 * 1024),
    )(x_pad, w1, b1, w2, b2,
      sched["src"], sched["dst"], sched["scale"], sched["recv"], ex,
      wpy, wpe, bp, wu, bu)

    # TODO(synk): for production graph sizes replace the O(E*N) one-hot gather/scatter matmuls
    # with an indexed gather (scalar-prefetched SMEM indices + dynamic-slice loop) and tile the
    # node axis in <=512-row chunks to stay inside v7x's 64 MiB VMEM.
    return jnp.concatenate([out[0, :n_nodes, :d], out[1, :n_nodes, :d]], axis=1)


# ---------------------------------------------------------------------------
# Pure-JAX reference (correctness check only)
# ---------------------------------------------------------------------------
def _ref_node_transform(x, p):
    h = jnp.maximum(x @ p["w1"] + p["b1"], 0.0)
    return h @ p["w2"] + p["b2"]


def _ref_mp_layer(y, src, dst, edge_x, p, reverse):
    e_src, e_dst = (dst, src) if reverse else (src, dst)
    n = y.shape[0]
    num_e = len(e_src)
    levels = _topo_levels(n, e_src, e_dst)
    for frontier in levels[1:]:
        row = {v: i for i, v in enumerate(frontier)}
        eidx = [j for j in range(num_e) if int(e_dst[j]) in row]
        y_src = y[np.array([int(e_src[j]) for j in eidx])]
        ex = edge_x[np.array(eidx)]
        deg = np.zeros((len(frontier),), np.float32)
        for j in eidx:
            deg[row[int(e_dst[j])]] += 1.0
        agg = np.zeros((len(frontier), len(eidx)), np.float32)
        for c, j in enumerate(eidx):
            r = row[int(e_dst[j])]
            agg[r, c] = 1.0 / deg[r]
        msg = jnp.maximum(jnp.concatenate([y_src, ex], axis=1) @ p["wp"] + p["bp"], 0.0)
        z = jnp.asarray(agg) @ msg
        h = jnp.maximum(z @ p["wu"] + p["bu"], 0.0) + y[np.array(frontier)]
        y = y.at[np.array(frontier)].set(h)
    return y


def _ref_forward(node_x, edge_x, src, dst, params):
    y = _ref_node_transform(node_x, params["nt"])
    hf = _ref_mp_layer(y, src, dst, edge_x, params["fmp"], False)
    y = _ref_node_transform(node_x, params["nt"])
    hb = _ref_mp_layer(y, src, dst, edge_x, params["bmp"], True)
    return jnp.concatenate([hf, hb], axis=1)


# ---------------------------------------------------------------------------
# Deterministic parameter init (PyTorch-Linear-like uniform bounds)
# ---------------------------------------------------------------------------
def init_params(key, node_dim, edge_dim, out_dim):
    d = out_dim // 2

    def linear(k, fan_in, fan_out):
        kw, kb = jax.random.split(k)
        bound = 1.0 / math.sqrt(fan_in)
        w = jax.random.uniform(kw, (fan_in, fan_out), jnp.float32, -bound, bound)
        b = jax.random.uniform(kb, (1, fan_out), jnp.float32, -bound, bound)
        return w, b

    k = jax.random.split(key, 6)
    w1, b1 = linear(k[0], node_dim, node_dim)
    w2, b2 = linear(k[1], node_dim, d)
    wpf, bpf = linear(k[2], d + edge_dim, d + edge_dim)
    wuf, buf_ = linear(k[3], d + edge_dim, d)
    wpb, bpb = linear(k[4], d + edge_dim, d + edge_dim)
    wub, bub = linear(k[5], d + edge_dim, d)
    return dict(
        nt=dict(w1=w1, b1=b1, w2=w2, b2=b2),
        fmp=dict(wp=wpf, bp=bpf, wu=wuf, bu=buf_),
        bmp=dict(wp=wpb, bp=bpb, wu=wub, bu=bub),
    )


if __name__ == "__main__":
    node_dim, edge_dim, out_dim = 12, 4, 16
    n_nodes = 8
    # small DAG with topological levels {0,1} -> {2,3} -> {4,5} -> {6,7}
    src = np.array([0, 1, 0, 2, 3, 2, 4, 5, 5, 3], dtype=np.int32)
    dst = np.array([2, 2, 3, 4, 4, 5, 6, 6, 7, 7], dtype=np.int32)
    n_edges = len(src)

    key = jax.random.PRNGKey(0)
    k_x, k_e, k_p = jax.random.split(key, 3)
    node_x = jax.random.normal(k_x, (n_nodes, node_dim), jnp.float32)
    edge_x = jax.random.normal(k_e, (n_edges, edge_dim), jnp.float32)
    params = init_params(k_p, node_dim, edge_dim, out_dim)

    sched = build_schedule(n_nodes, src, dst)
    out = giph_forward(node_x, edge_x, sched, params)
    out = jax.block_until_ready(out)

    ref = _ref_forward(node_x, edge_x, src, dst, params)
    ref = jax.block_until_ready(ref)

    assert out.shape == (n_nodes, out_dim)
    # tolerance 1e-3: the bf16 hi/lo one-hot gather/scatter is exact to ~2^-18 relative, so the
    # kernel tracks the fp32 reference far inside this bound.
    np.testing.assert_allclose(np.asarray(out), np.asarray(ref), rtol=1e-3, atol=1e-3)
    print("KERNEL_OK")
</pallas_src>

<mosaic_0001>
module attributes {stable_mosaic.version = 11 : i64} {
  func.func @_giph_fused_kernel(%arg0: i32, %arg1: i32, %arg2: memref<8x128xf32, #tpu.memory_space<vmem>>, %arg3: memref<128x128xf32, #tpu.memory_space<vmem>>, %arg4: memref<1x128xf32, #tpu.memory_space<vmem>>, %arg5: memref<128x128xf32, #tpu.memory_space<vmem>>, %arg6: memref<1x128xf32, #tpu.memory_space<vmem>>, %arg7: memref<1x3x8x1xi32, #tpu.memory_space<vmem>>, %arg8: memref<1x3x1x8xi32, #tpu.memory_space<vmem>>, %arg9: memref<1x3x8x1xf32, #tpu.memory_space<vmem>>, %arg10: memref<1x3x8x1xf32, #tpu.memory_space<vmem>>, %arg11: memref<1x3x8x128xf32, #tpu.memory_space<vmem>>, %arg12: memref<1x128x128xf32, #tpu.memory_space<vmem>>, %arg13: memref<1x128x128xf32, #tpu.memory_space<vmem>>, %arg14: memref<1x1x128xf32, #tpu.memory_space<vmem>>, %arg15: memref<1x128x128xf32, #tpu.memory_space<vmem>>, %arg16: memref<1x1x128xf32, #tpu.memory_space<vmem>>, %arg17: memref<1x8x128xf32, #tpu.memory_space<vmem>>) attributes {dimension_semantics = [#tpu.dimension_semantics<parallel>, #tpu.dimension_semantics<arbitrary>], iteration_bounds = array<i64: 2, 3>, scalar_prefetch = 0 : i64, scratch_operands = 0 : i64, tpu.core_type = #tpu.core_type<tc>, window_params = [{pipeline_mode = #tpu.pipeline_mode<synchronous>, transform_indices = @transform_0, window_bounds = array<i64: 8, 128>}, {pipeline_mode = #tpu.pipeline_mode<synchronous>, transform_indices = @transform_1, window_bounds = array<i64: 128, 128>}, {pipeline_mode = #tpu.pipeline_mode<synchronous>, transform_indices = @transform_2, window_bounds = array<i64: 1, 128>}, {pipeline_mode = #tpu.pipeline_mode<synchronous>, transform_indices = @transform_3, window_bounds = array<i64: 128, 128>}, {pipeline_mode = #tpu.pipeline_mode<synchronous>, transform_indices = @transform_4, window_bounds = array<i64: 1, 128>}, {transform_indices = @transform_5, window_bounds = array<i64: 1, 3, 8, 1>}, {transform_indices = @transform_6, window_bounds = array<i64: 1, 3, 1, 8>}, {transform_indices = @transform_7, window_bounds = array<i64: 1, 3, 8, 1>}, {transform_indices = @transform_8, window_bounds = array<i64: 1, 3, 8, 1>}, {transform_indices = @transform_9, window_bounds = array<i64: 1, 3, 8, 128>}, {transform_indices = @transform_10, window_bounds = array<i64: 1, 128, 128>}, {transform_indices = @transform_11, window_bounds = array<i64: 1, 128, 128>}, {transform_indices = @transform_12, window_bounds = array<i64: 1, 1, 128>}, {transform_indices = @transform_13, window_bounds = array<i64: 1, 128, 128>}, {transform_indices = @transform_14, window_bounds = array<i64: 1, 1, 128>}, {transform_indices = @transform_15, window_bounds = array<i64: 1, 8, 128>}]} {
    %c0_i32 = arith.constant 0 : i32
    %0 = arith.cmpi eq, %arg1, %c0_i32 : i32
    %1 = arith.extui %0 : i1 to i32
    %c0_i32_0 = arith.constant 0 : i32
    %2 = arith.cmpi ne, %1, %c0_i32_0 : i32
    scf.if %2 {
      %c0_44 = arith.constant 0 : index
      %c0_45 = arith.constant 0 : index
      %76 = vector.load %arg2[%c0_44, %c0_45] : memref<8x128xf32, #tpu.memory_space<vmem>>, vector<8x128xf32>
      %c0_46 = arith.constant 0 : index
      %c0_47 = arith.constant 0 : index
      %77 = vector.load %arg3[%c0_46, %c0_47] : memref<128x128xf32, #tpu.memory_space<vmem>>, vector<128x128xf32>
      %cst_48 = arith.constant dense<0.000000e+00> : vector<8x128xf32>
      %78 = tpu.matmul %76, %77, %cst_48 {dimension_numbers = #tpu.dot_dimension_numbers<[1], [0], [0], [1], [0, 0, 1, 1], [], []>} : vector<8x128xf32>, vector<128x128xf32>, vector<8x128xf32> -> vector<8x128xf32>
      %c0_49 = arith.constant 0 : index
      %c0_50 = arith.constant 0 : index
      %79 = vector.load %arg4[%c0_49, %c0_50] : memref<1x128xf32, #tpu.memory_space<vmem>>, vector<1x128xf32>
      %80 = vector.broadcast %79 : vector<1x128xf32> to vector<8x128xf32>
      %81 = arith.addf %78, %80 : vector<8x128xf32>
      %cst_51 = arith.constant 0.000000e+00 : f32
      %82 = vector.broadcast %cst_51 : f32 to vector<8x128xf32>
      %83 = arith.maximumf %81, %82 : vector<8x128xf32>
      %c0_52 = arith.constant 0 : index
      %c0_53 = arith.constant 0 : index
      %84 = vector.load %arg5[%c0_52, %c0_53] : memref<128x128xf32, #tpu.memory_space<vmem>>, vector<128x128xf32>
      %cst_54 = arith.constant dense<0.000000e+00> : vector<8x128xf32>
      %85 = tpu.matmul %83, %84, %cst_54 {dimension_numbers = #tpu.dot_dimension_numbers<[1], [0], [0], [1], [0, 0, 1, 1], [], []>} : vector<8x128xf32>, vector<128x128xf32>, vector<8x128xf32> -> vector<8x128xf32>
      %c0_55 = arith.constant 0 : index
      %c0_56 = arith.constant 0 : index
      %86 = vector.load %arg6[%c0_55, %c0_56] : memref<1x128xf32, #tpu.memory_space<vmem>>, vector<1x128xf32>
      %87 = vector.broadcast %86 : vector<1x128xf32> to vector<8x128xf32>
      %88 = arith.addf %85, %87 : vector<8x128xf32>
      %c0_57 = arith.constant 0 : index
      %c0_58 = arith.constant 0 : index
      %c0_59 = arith.constant 0 : index
      %89 = vector.load %arg17[%c0_57, %c0_58, %c0_59] : memref<1x8x128xf32, #tpu.memory_space<vmem>>, vector<1x8x128xf32>
      %90 = vector.shape_cast %89 : vector<1x8x128xf32> to vector<8x128xf32>
      %91 = vector.shape_cast %88 : vector<8x128xf32> to vector<1x8x128xf32>
      tpu.vector_store %arg17[%c0_57, %c0_58, %c0_59], %91 {strides = array<i32>} : memref<1x8x128xf32, #tpu.memory_space<vmem>>, vector<1x8x128xf32>,
    } else {
    }
    %c0 = arith.constant 0 : index
    %c0_1 = arith.constant 0 : index
    %c0_2 = arith.constant 0 : index
    %3 = vector.load %arg17[%c0, %c0_1, %c0_2] : memref<1x8x128xf32, #tpu.memory_space<vmem>>, vector<1x8x128xf32>
    %4 = vector.shape_cast %3 : vector<1x8x128xf32> to vector<8x128xf32>
    %c0_3 = arith.constant 0 : index
    %5 = arith.index_cast %arg1 : i32 to index
    %c0_4 = arith.constant 0 : index
    %c0_5 = arith.constant 0 : index
    %6 = vector.load %arg7[%c0_3, %5, %c0_4, %c0_5] : memref<1x3x8x1xi32, #tpu.memory_space<vmem>>, vector<1x1x8x1xi32>
    %7 = vector.shape_cast %6 : vector<1x1x8x1xi32> to vector<8x1xi32>
    %8 = tpu.iota {dimensions = array<i32: 1>} : vector<8x8xi32>
    %9 = vector.broadcast %7 : vector<8x1xi32> to vector<8x8xi32>
    %10 = arith.cmpi eq, %8, %9 : vector<8x8xi32>
    %11 = arith.extui %10 : vector<8x8xi1> to vector<8x8xi32>
    %12 = arith.sitofp %11 : vector<8x8xi32> to vector<8x8xf32>
    %13 = arith.truncf %12 : vector<8x8xf32> to vector<8x8xbf16>
    %14 = arith.truncf %4 : vector<8x128xf32> to vector<8x128xbf16>
    %15 = arith.extf %14 : vector<8x128xbf16> to vector<8x128xf32>
    %16 = arith.subf %4, %15 : vector<8x128xf32>
    %17 = arith.truncf %16 : vector<8x128xf32> to vector<8x128xbf16>
    %cst = arith.constant dense<0.000000e+00> : vector<8x128xf32>
    %18 = tpu.matmul %13, %14, %cst {dimension_numbers = #tpu.dot_dimension_numbers<[1], [0], [0], [1], [0, 0, 1, 1], [], []>} : vector<8x8xbf16>, vector<8x128xbf16>, vector<8x128xf32> -> vector<8x128xf32>
    %cst_6 = arith.constant dense<0.000000e+00> : vector<8x128xf32>
    %19 = tpu.matmul %13, %17, %cst_6 {dimension_numbers = #tpu.dot_dimension_numbers<[1], [0], [0], [1], [0, 0, 1, 1], [], []>} : vector<8x8xbf16>, vector<8x128xbf16>, vector<8x128xf32> -> vector<8x128xf32>
    %20 = arith.addf %18, %19 : vector<8x128xf32>
    %c0_7 = arith.constant 0 : index
    %c0_8 = arith.constant 0 : index
    %c0_9 = arith.constant 0 : index
    %21 = vector.load %arg12[%c0_7, %c0_8, %c0_9] : memref<1x128x128xf32, #tpu.memory_space<vmem>>, vector<1x128x128xf32>
    %22 = vector.shape_cast %21 : vector<1x128x128xf32> to vector<128x128xf32>
    %cst_10 = arith.constant dense<0.000000e+00> : vector<8x128xf32>
    %23 = tpu.matmul %20, %22, %cst_10 {dimension_numbers = #tpu.dot_dimension_numbers<[1], [0], [0], [1], [0, 0, 1, 1], [], []>} : vector<8x128xf32>, vector<128x128xf32>, vector<8x128xf32> -> vector<8x128xf32>
    %c0_11 = arith.constant 0 : index
    %24 = arith.index_cast %arg1 : i32 to index
    %c0_12 = arith.constant 0 : index
    %c0_13 = arith.constant 0 : index
    %25 = vector.load %arg11[%c0_11, %24, %c0_12, %c0_13] : memref<1x3x8x128xf32, #tpu.memory_space<vmem>>, vector<1x1x8x128xf32>
    %26 = vector.shape_cast %25 : vector<1x1x8x128xf32> to vector<8x128xf32>
    %c0_14 = arith.constant 0 : index
    %c0_15 = arith.constant 0 : index
    %c0_16 = arith.constant 0 : index
    %27 = vector.load %arg13[%c0_14, %c0_15, %c0_16] : memref<1x128x128xf32, #tpu.memory_space<vmem>>, vector<1x128x128xf32>
    %28 = vector.shape_cast %27 : vector<1x128x128xf32> to vector<128x128xf32>
    %cst_17 = arith.constant dense<0.000000e+00> : vector<8x128xf32>
    %29 = tpu.matmul %26, %28, %cst_17 {dimension_numbers = #tpu.dot_dimension_numbers<[1], [0], [0], [1], [0, 0, 1, 1], [], []>} : vector<8x128xf32>, vector<128x128xf32>, vector<8x128xf32> -> vector<8x128xf32>
    %30 = arith.addf %23, %29 : vector<8x128xf32>
    %c0_18 = arith.constant 0 : index
    %c0_19 = arith.constant 0 : index
    %c0_20 = arith.constant 0 : index
    %31 = vector.load %arg14[%c0_18, %c0_19, %c0_20] : memref<1x1x128xf32, #tpu.memory_space<vmem>>, vector<1x1x128xf32>
    %32 = vector.shape_cast %31 : vector<1x1x128xf32> to vector<1x128xf32>
    %33 = vector.broadcast %32 : vector<1x128xf32> to vector<8x128xf32>
    %34 = arith.addf %30, %33 : vector<8x128xf32>
    %cst_21 = arith.constant 0.000000e+00 : f32
    %35 = vector.broadcast %cst_21 : f32 to vector<8x128xf32>
    %36 = arith.maximumf %34, %35 : vector<8x128xf32>
    %c0_22 = arith.constant 0 : index
    %37 = arith.index_cast %arg1 : i32 to index
    %c0_23 = arith.constant 0 : index
    %c0_24 = arith.constant 0 : index
    %38 = vector.load %arg8[%c0_22, %37, %c0_23, %c0_24] : memref<1x3x1x8xi32, #tpu.memory_space<vmem>>, vector<1x1x1x8xi32>
    %39 = vector.shape_cast %38 : vector<1x1x1x8xi32> to vector<1x8xi32>
    %40 = tpu.iota {dimensions = array<i32: 0>} : vector<8x8xi32>
    %41 = vector.broadcast %39 : vector<1x8xi32> to vector<8x8xi32>
    %42 = arith.cmpi eq, %40, %41 : vector<8x8xi32>
    %43 = arith.extui %42 : vector<8x8xi1> to vector<8x8xi32>
    %44 = arith.sitofp %43 : vector<8x8xi32> to vector<8x8xf32>
    %45 = arith.truncf %44 : vector<8x8xf32> to vector<8x8xbf16>
    %c0_25 = arith.constant 0 : index
    %46 = arith.index_cast %arg1 : i32 to index
    %c0_26 = arith.constant 0 : index
    %c0_27 = arith.constant 0 : index
    %47 = vector.load %arg9[%c0_25, %46, %c0_26, %c0_27] : memref<1x3x8x1xf32, #tpu.memory_space<vmem>>, vector<1x1x8x1xf32>
    %48 = vector.shape_cast %47 : vector<1x1x8x1xf32> to vector<8x1xf32>
    %49 = arith.truncf %36 : vector<8x128xf32> to vector<8x128xbf16>
    %50 = arith.extf %49 : vector<8x128xbf16> to vector<8x128xf32>
    %51 = arith.subf %36, %50 : vector<8x128xf32>
    %52 = arith.truncf %51 : vector<8x128xf32> to vector<8x128xbf16>
    %cst_28 = arith.constant dense<0.000000e+00> : vector<8x128xf32>
    %53 = tpu.matmul %45, %49, %cst_28 {dimension_numbers = #tpu.dot_dimension_numbers<[1], [0], [0], [1], [0, 0, 1, 1], [], []>} : vector<8x8xbf16>, vector<8x128xbf16>, vector<8x128xf32> -> vector<8x128xf32>
    %cst_29 = arith.constant dense<0.000000e+00> : vector<8x128xf32>
    %54 = tpu.matmul %45, %52, %cst_29 {dimension_numbers = #tpu.dot_dimension_numbers<[1], [0], [0], [1], [0, 0, 1, 1], [], []>} : vector<8x8xbf16>, vector<8x128xbf16>, vector<8x128xf32> -> vector<8x128xf32>
    %55 = arith.addf %53, %54 : vector<8x128xf32>
    %56 = vector.broadcast %48 : vector<8x1xf32> to vector<8x128xf32>
    %57 = arith.mulf %56, %55 : vector<8x128xf32>
    %c0_30 = arith.constant 0 : index
    %c0_31 = arith.constant 0 : index
    %c0_32 = arith.constant 0 : index
    %58 = vector.load %arg15[%c0_30, %c0_31, %c0_32] : memref<1x128x128xf32, #tpu.memory_space<vmem>>, vector<1x128x128xf32>
    %59 = vector.shape_cast %58 : vector<1x128x128xf32> to vector<128x128xf32>
    %cst_33 = arith.constant dense<0.000000e+00> : vector<8x128xf32>
    %60 = tpu.matmul %57, %59, %cst_33 {dimension_numbers = #tpu.dot_dimension_numbers<[1], [0], [0], [1], [0, 0, 1, 1], [], []>} : vector<8x128xf32>, vector<128x128xf32>, vector<8x128xf32> -> vector<8x128xf32>
    %c0_34 = arith.constant 0 : index
    %c0_35 = arith.constant 0 : index
    %c0_36 = arith.constant 0 : index
    %61 = vector.load %arg16[%c0_34, %c0_35, %c0_36] : memref<1x1x128xf32, #tpu.memory_space<vmem>>, vector<1x1x128xf32>
    %62 = vector.shape_cast %61 : vector<1x1x128xf32> to vector<1x128xf32>
    %63 = vector.broadcast %62 : vector<1x128xf32> to vector<8x128xf32>
    %64 = arith.addf %60, %63 : vector<8x128xf32>
    %cst_37 = arith.constant 0.000000e+00 : f32
    %65 = vector.broadcast %cst_37 : f32 to vector<8x128xf32>
    %66 = arith.maximumf %64, %65 : vector<8x128xf32>
    %c0_38 = arith.constant 0 : index
    %67 = arith.index_cast %arg1 : i32 to index
    %c0_39 = arith.constant 0 : index
    %c0_40 = arith.constant 0 : index
    %68 = vector.load %arg10[%c0_38, %67, %c0_39, %c0_40] : memref<1x3x8x1xf32, #tpu.memory_space<vmem>>, vector<1x1x8x1xf32>
    %69 = vector.shape_cast %68 : vector<1x1x8x1xf32> to vector<8x1xf32>
    %70 = vector.broadcast %69 : vector<8x1xf32> to vector<8x128xf32>
    %71 = arith.mulf %70, %66 : vector<8x128xf32>
    %72 = arith.addf %4, %71 : vector<8x128xf32>
    %c0_41 = arith.constant 0 : index
    %c0_42 = arith.constant 0 : index
    %c0_43 = arith.constant 0 : index
    %73 = vector.load %arg17[%c0_41, %c0_42, %c0_43] : memref<1x8x128xf32, #tpu.memory_space<vmem>>, vector<1x8x128xf32>
    %74 = vector.shape_cast %73 : vector<1x8x128xf32> to vector<8x128xf32>
    %75 = vector.shape_cast %72 : vector<8x128xf32> to vector<1x8x128xf32>
    tpu.vector_store %arg17[%c0_41, %c0_42, %c0_43], %75 {strides = array<i32>} : memref<1x8x128xf32, #tpu.memory_space<vmem>>, vector<1x8x128xf32>,
    return
  }
  func.func @transform_0(%arg0: i32, %arg1: i32) -> (i32, i32) {
    %c0_i32 = arith.constant 0 : i32
    %c0_i32_0 = arith.constant 0 : i32
    %c0_i32_1 = arith.constant 0 : i32
    return %c0_i32, %c0_i32_0 : i32, i32
  }
  func.func @transform_1(%arg0: i32, %arg1: i32) -> (i32, i32) {
    %c0_i32 = arith.constant 0 : i32
    %c0_i32_0 = arith.constant 0 : i32
    %c0_i32_1 = arith.constant 0 : i32
    return %c0_i32, %c0_i32_0 : i32, i32
  }
  func.func @transform_2(%arg0: i32, %arg1: i32) -> (i32, i32) {
    %c0_i32 = arith.constant 0 : i32
    %c0_i32_0 = arith.constant 0 : i32
    %c0_i32_1 = arith.constant 0 : i32
    return %c0_i32, %c0_i32_0 : i32, i32
  }
  func.func @transform_3(%arg0: i32, %arg1: i32) -> (i32, i32) {
    %c0_i32 = arith.constant 0 : i32
    %c0_i32_0 = arith.constant 0 : i32
    %c0_i32_1 = arith.constant 0 : i32
    return %c0_i32, %c0_i32_0 : i32, i32
  }
  func.func @transform_4(%arg0: i32, %arg1: i32) -> (i32, i32) {
    %c0_i32 = arith.constant 0 : i32
    %c0_i32_0 = arith.constant 0 : i32
    %c0_i32_1 = arith.constant 0 : i32
    return %c0_i32, %c0_i32_0 : i32, i32
  }
  func.func @transform_5(%arg0: i32, %arg1: i32) -> (i32, i32, i32, i32) {
    %c0_i32 = arith.constant 0 : i32
    %c0_i32_0 = arith.constant 0 : i32
    %c0_i32_1 = arith.constant 0 : i32
    %c0_i32_2 = arith.constant 0 : i32
    return %arg0, %c0_i32, %c0_i32_0, %c0_i32_1 : i32, i32, i32, i32
  }
  func.func @transform_6(%arg0: i32, %arg1: i32) -> (i32, i32, i32, i32) {
    %c0_i32 = arith.constant 0 : i32
    %c0_i32_0 = arith.constant 0 : i32
    %c0_i32_1 = arith.constant 0 : i32
    %c0_i32_2 = arith.constant 0 : i32
    return %arg0, %c0_i32, %c0_i32_0, %c0_i32_1 : i32, i32, i32, i32
  }
  func.func @transform_7(%arg0: i32, %arg1: i32) -> (i32, i32, i32, i32) {
    %c0_i32 = arith.constant 0 : i32
    %c0_i32_0 = arith.constant 0 : i32
    %c0_i32_1 = arith.constant 0 : i32
    %c0_i32_2 = arith.constant 0 : i32
    return %arg0, %c0_i32, %c0_i32_0, %c0_i32_1 : i32, i32, i32, i32
  }
  func.func @transform_8(%arg0: i32, %arg1: i32) -> (i32, i32, i32, i32) {
    %c0_i32 = arith.constant 0 : i32
    %c0_i32_0 = arith.constant 0 : i32
    %c0_i32_1 = arith.constant 0 : i32
    %c0_i32_2 = arith.constant 0 : i32
    return %arg0, %c0_i32, %c0_i32_0, %c0_i32_1 : i32, i32, i32, i32
  }
  func.func @transform_9(%arg0: i32, %arg1: i32) -> (i32, i32, i32, i32) {
    %c0_i32 = arith.constant 0 : i32
    %c0_i32_0 = arith.constant 0 : i32
    %c0_i32_1 = arith.constant 0 : i32
    %c0_i32_2 = arith.constant 0 : i32
    return %arg0, %c0_i32, %c0_i32_0, %c0_i32_1 : i32, i32, i32, i32
  }
  func.func @transform_10(%arg0: i32, %arg1: i32) -> (i32, i32, i32) {
    %c0_i32 = arith.constant 0 : i32
    %c0_i32_0 = arith.constant 0 : i32
    %c0_i32_1 = arith.constant 0 : i32
    return %arg0, %c0_i32, %c0_i32_0 : i32, i32, i32
  }
  func.func @transform_11(%arg0: i32, %arg1: i32) -> (i32, i32, i32) {
    %c0_i32 = arith.constant 0 : i32
    %c0_i32_0 = arith.constant 0 : i32
    %c0_i32_1 = arith.constant 0 : i32
    return %arg0, %c0_i32, %c0_i32_0 : i32, i32, i32
  }
  func.func @transform_12(%arg0: i32, %arg1: i32) -> (i32, i32, i32) {
    %c0_i32 = arith.constant 0 : i32
    %c0_i32_0 = arith.constant 0 : i32
    %c0_i32_1 = arith.constant 0 : i32
    return %arg0, %c0_i32, %c0_i32_0 : i32, i32, i32
  }
  func.func @transform_13(%arg0: i32, %arg1: i32) -> (i32, i32, i32) {
    %c0_i32 = arith.constant 0 : i32
    %c0_i32_0 = arith.constant 0 : i32
    %c0_i32_1 = arith.constant 0 : i32
    return %arg0, %c0_i32, %c0_i32_0 : i32, i32, i32
  }
  func.func @transform_14(%arg0: i32, %arg1: i32) -> (i32, i32, i32) {
    %c0_i32 = arith.constant 0 : i32
    %c0_i32_0 = arith.constant 0 : i32
    %c0_i32_1 = arith.constant 0 : i32
    return %arg0, %c0_i32, %c0_i32_0 : i32, i32, i32
  }
  func.func @transform_15(%arg0: i32, %arg1: i32) -> (i32, i32, i32) {
    %c0_i32 = arith.constant 0 : i32
    %c0_i32_0 = arith.constant 0 : i32
    %c0_i32_1 = arith.constant 0 : i32
    return %arg0, %c0_i32, %c0_i32_0 : i32, i32, i32
  }
}

</mosaic_0001>

<bundles_post_ra>
// kernel: tpu_custom_call.1
= control target key start
LH: loop header
LB: loop body
LE: loop exit
PB: predicated region body
PF: predicated region fallthrough
CT: control target
= control target key end

     0   :  { %s2229_s0 = inlined_call_operand.vmem [shape: f32[8,128], index: 0, kind: input, shape index: {}]   ;;  %s2230_s1 = inlined_call_operand.hbm [shape: f32[128,128], index: 1, kind: input, shape index: {}]   ;;  %s2231_s2 = inlined_call_operand.vmem [shape: f32[1,128], index: 2, kind: input, shape index: {}]   ;;  %s2232_s3 = inlined_call_operand.hbm [shape: f32[128,128], index: 3, kind: input, shape index: {}]   ;;  %s2233_s4 = inlined_call_operand.vmem [shape: f32[1,128], index: 4, kind: input, shape index: {}]   ;;  %s2234_s5 = inlined_call_operand.vmem [shape: s32[2,3,8,1], index: 5, kind: input, shape index: {}]   ;;  %s2235_s6 = inlined_call_operand.vmem [shape: s32[2,3,1,8], index: 6, kind: input, shape index: {}]   ;;  %s2236_s7 = inlined_call_operand.vmem [shape: f32[2,3,8,1], index: 7, kind: input, shape index: {}]   ;;  %s2237_s8 = inlined_call_operand.vmem [shape: f32[2,3,8,1], index: 8, kind: input, shape index: {}]   ;;  %s2238_s9 = inlined_call_operand.vmem [shape: f32[2,3,8,128], index: 9, kind: input, shape index: {}]   ;;  %s2239_s10 = inlined_call_operand.hbm [shape: f32[2,128,128], index: 10, kind: input, shape index: {}]   ;;  %s2240_s11 = inlined_call_operand.hbm [shape: f32[2,128,128], index: 11, kind: input, shape index: {}]   ;;  %s2241_s12 = inlined_call_operand.vmem [shape: f32[2,1,128], index: 12, kind: input, shape index: {}]   ;;  %s2242_s13 = inlined_call_operand.hbm [shape: f32[2,128,128], index: 13, kind: input, shape index: {}]   ;;  %s2243_s14 = inlined_call_operand.vmem [shape: f32[2,1,128], index: 14, kind: input, shape index: {}]   ;;  %s2244_s15 = inlined_call_operand.hbm [shape: f32[2,8,128], index: 15, kind: output, shape index: {}]  }
   0x1   :  { %2262 = sst [smem:[#allocation27_spill]] %s2229_s0 }
   0x2   :  { %2263 = sst [smem:[#allocation28_spill]] %s2230_s1 }
   0x3   :  { %2264 = sst [smem:[#allocation29_spill]] %s2231_s2 }
   0x4   :  { %2265 = sst [smem:[#allocation30_spill]] %s2232_s3 }
   0x5   :  { %2266 = sst [smem:[#allocation31_spill]] %s2233_s4 }
   0x6   :  { %2267 = sst [smem:[#allocation32_spill]] %s2235_s6 }
   0x7   :  { %2268 = sst [smem:[#allocation33_spill]] %s2236_s7 }
   0x8   :  { %2269 = sst [smem:[#allocation34_spill]] %s2237_s8 }
   0x9   :  { %2270 = sst [smem:[#allocation35_spill]] %s2238_s9 }
   0xa   :  { %2271 = sst [smem:[#allocation36_spill]] %s2239_s10 }
   0xb   :  { %2272 = sst [smem:[#allocation37_spill]] %s2240_s11 }
   0xc   :  { %2273 = sst [smem:[#allocation38_spill]] %s2242_s13 }
   0xd   :  { %2274 = sst [smem:[#allocation39_spill]] %s2244_s15 }
   0xe   :  { %20 = vsyncpa [#allocation3], 0 }
   0xf   :  { %21 = vsyncpa [#allocation6], 0 }
  0x10   :  { %22 = vsyncpa [#allocation4], 0 }
  0x11   :  { %24 = vsyncpa [#allocation4 + $0x1], 0  ;;  %s1840_s18 = smov 0   ;;  %s1842_s19 = smov 0  }
  0x12   :  { %s1844_s20 = smov 0   ;;  %s1846_s21 = smov 0  }
  0x13   :  { %s1848_s22 = smov 0   ;;  %s1850_s23 = smov 0  }
  0x14   :  { %s1852_s24 = smov 0   ;;  %s1854_s25 = smov 0  }
  0x15 LB: > { %2275 = sst [smem:[#allocation15_spill]] %s1724_s18  ;;  %s1881_s26 = sadd.s32 4294967295, %s1752_s25   ;;  %s1752_s25 = sphi %s1854_s25, %s30_s25   ;;  %s1748_s24 = sphi %s1852_s24, %s2326_s24   ;;  %s1744_s23 = sphi %s1850_s23, %s2325_s23   ;;  %s1740_s22 = sphi %s1848_s22, %s2324_s22   ;;  %s1736_s21 = sphi %s1846_s21, %s2323_s21   ;;  %s1732_s20 = sphi %s1844_s20, %s2322_s20   ;;  %s1728_s19 = sphi %s1842_s19, %s2321_s19   ;;  %s1724_s18 = sphi %s1840_s18, %s2320_s18  }
  0x16   : > { %2276 = sst [smem:[#allocation16_spill]] %s1728_s19  ;;  %s1334_s27 = sadd.s32 4294967294, %s1752_s25  }
  0x17   : > { %2277 = sst [smem:[#allocation17_spill]] %s1732_s20  ;;  %p297_p0 = scmp.ne.s32.totalorder %s1728_s19, %s1724_s18 }
  0x18   : > { %2278 = sst [smem:[#allocation18_spill]] %s1736_s21  ;;  %p298_p1 = scmp.eq.s32.totalorder %s1881_s26, 0 }
  0x19   : > { %2279 = sst [smem:[#allocation19_spill]] %s1744_s23  ;;  %p425_p2 = scmp.eq.s32.totalorder %s1881_s26, 5 }
  0x1a   : > { %2280 = sst [smem:[#allocation20_spill]] %s1748_s24  ;;  %p431_p3 = scmp.eq.s32.totalorder %s1334_s27, 5 }
  0x1b   : > { %2281 = sst [smem:[#allocation21_spill]] %s1752_s25  ;;  %p1890_p4 = por %p298_p1, %p297_p0 }
  0x1c   : > { %p1335_p5 = scmp.ge.s32.totalorder %s1752_s25, 1  ;;  %p1895_p6 = por %p431_p3, %p297_p0 }
  0x1d   : > { %p438_p7 = scmp.lt.s32.totalorder %s1752_s25, 7  ;;  %s2285_s1 = sld [smem:[#allocation28_spill]] }
  0x1e   : > { %s2283_s29 = scalar_select %p1895_p6, 1, 0 }
  0x1f   : > { %p1903_p8 = pnand %p1335_p5, %p438_p7  ;;  %s2248_s16 = smov 128  }
  0x20   : > { %2284 = sst [smem:[#allocation22_spill]] %s2283_s29  ;;  %s1754_s29 = smov [#allocation2]  }
  0x21   : > { %p1392_p9 = pneg %p1903_p8  ;;  %s454_s18 = sshll.u32 %s1754_s29, 4  ;;  %s455_s18 = int_to_ptr.vmem [resolvable:$true] %s454_s18 }
  0x22   : > { %s39_s15 = sadd.s32 1, %s1744_s23  ;;  %s42_s29 = sadd.s32 1, %s1748_s24 }
  0x23   : > { %s452_s17 = sshll.u32 %s2285_s1, 4  ;;  %p1911_p10 = pnand %p1392_p9, %p298_p1  ;;  %s453_s17 = int_to_ptr.hbm [resolvable:$true] %s452_s17 }
  0x24   : > { %s2250_s1 = smov 8   ;;  %p40_p11 = scmp.ge.s32.totalorder %s39_s15, 3 }
  0x25   : > { %1395 = dma.hbm_to_vmem [thread:$0]  (!%p1911_p10), %s453_s17, 2048, %s455_s18, [#allocation3], %s2248_s16, %s2248_s16, %s2250_s1  }
  0x26   : > { %s284_s4 = sadd.s32 1, %s1732_s20  ;;  %p291_p12 = scmp.ne.s32.totalorder %s1732_s20, %s1728_s19 }
  0x27   : > { %s2328_s15 = smov (%p40_p11, %s39_s15), 0  ;;  %s2330_s29 = smov (!%p40_p11, %s42_s29), %s1748_s24 }
  0x28   : > { %2288 = sst [smem:[#allocation23_spill]] %s2328_s15  ;;  %p292_p13 = scmp.eq.s32.totalorder %s1752_s25, 0 }
  0x29   : > { %p1931_p0 = por %p425_p2, %p291_p12  ;;  %p44_p3 = scmp.ge.s32.totalorder %s2330_s29, 2 }
  0x2a   : > { %p1415_p5 = scmp.lt.s32.totalorder %s1752_s25, 6  ;;  %p1936_p7 = por %p292_p13, %p291_p12 }
  0x2b   : > { %s2289_s2 = scalar_select %p1931_p0, 1, 0 }
  0x2c   : > { %s527_s17 = sand.u32 1, %s1752_s25   ;;  %s2332_s29 = smov (%p44_p3, %s2330_s29), 0 }
  0x2d   : > { %2290 = sst [smem:[#allocation24_spill]] %s2289_s2  ;;  %s529_s16 = sand.u32 1, %s1732_s20  }
  0x2e   : > { %2292 = sst [smem:[#allocation25_spill]] %s2332_s29  ;;  %s281_s1 = ssub.s32 %s1748_s24, %s2332_s29 }
  0x2f   : > { %s1946_s15 = sshll.u32 %s529_s16, 7  ;;  %p282_p2 = scmp.eq.s32.totalorder %s281_s1, 0 }
  0x30   : > { %s1371_s23 = sshll.u32 %s1748_s24, 7  ;;  %s531_s2 = scalar_lea.vmem [#allocation7], %s1946_s15 }
  0x31   : > { %s539_s0 = sshll.u32 %s531_s2, 4  ;;  %s2294_s10 = sld [smem:[#allocation36_spill]]  ;;  %s540_s0 = int_to_ptr.vmem [resolvable:$true] %s539_s0 }
  0x32   : > { %s1951_s21 = scalar_select %p282_p2, %s1732_s20, %s284_s4  }
  0x33   : > { %p1960_p9 = pnand %p1415_p5, %p1936_p7  ;;  %s2296_s11 = sld [smem:[#allocation37_spill]] }
  0x34   : > { %2293 = sst [smem:[#allocation26_spill]] %s1951_s21  ;;  %s528_s16 = scalar_lea.sflag [#allocation3], %s527_s17 }
  0x35   : > { %s2297_s8 = smov 8   ;;  %s2298_s9 = smov 128  }
  0x36   : > { %s553_s18 = scalar_lea.vmem [#allocation8], %s1946_s15  ;;  %s2299_s3 = sld [smem:[#allocation30_spill]] }
  0x37   : > { %s536_s6 = scalar_lea.hbm %s2294_s10, %s1371_s23  ;;  %s561_s10 = sshll.u32 %s553_s18, 4  ;;  %s562_s10 = int_to_ptr.vmem [resolvable:$true] %s561_s10 }
  0x38   : > { %s537_s7 = sshll.u32 %s536_s6, 4  ;;  %s2300_s13 = sld [smem:[#allocation38_spill]]  ;;  %s538_s7 = int_to_ptr.hbm [resolvable:$true] %s537_s7 }
  0x39   : > { %s558_s4 = scalar_lea.hbm %s2296_s11, %s1371_s23  ;;  %s1757_s11 = smov [#allocation5]  }
  0x3a   : > { %1402 = dma.hbm_to_vmem [thread:$0]  (!%p1960_p9), %s538_s7, 2048, %s540_s0, %s528_s16, %s2298_s9, %s2298_s9, %s2297_s8  }
  0x3b   : > { %s559_s6 = sshll.u32 %s558_s4, 4  ;;  %s471_s24 = sshll.u32 %s1757_s11, 4  ;;  %s560_s6 = int_to_ptr.hbm [resolvable:$true] %s559_s6  ;;  %s472_s24 = int_to_ptr.vmem [resolvable:$true] %s471_s24 }
  0x3c   : > { %1405 = dma.hbm_to_vmem [thread:$0]  (!%p1960_p9), %s560_s6, 2048, %s562_s10, %s528_s16, %s2298_s9, %s2298_s9, %s2297_s8  }
  0x3d   : > { %s469_s17 = sshll.u32 %s2299_s3, 4  ;;  %s581_s18 = scalar_lea.vmem [#allocation9], %s1946_s15  ;;  %s470_s17 = int_to_ptr.hbm [resolvable:$true] %s469_s17 }
  0x3e   : > { %1398 = dma.hbm_to_vmem [thread:$0]  (!%p1911_p10), %s470_s17, 2048, %s472_s24, [#allocation6], %s2298_s9, %s2298_s9, %s2297_s8  }
  0x3f   : > { %s586_s4 = scalar_lea.hbm %s2300_s13, %s1371_s23  ;;  %s589_s21 = sshll.u32 %s581_s18, 4  ;;  %s590_s21 = int_to_ptr.vmem [resolvable:$true] %s589_s21 }
  0x40   : > { %s587_s10 = sshll.u32 %s586_s4, 4  ;;  %607 = sbr.rel (%p1903_p8) target bundleno = 1066 (0x42a), region = 80  ;;  %s588_s10 = int_to_ptr.hbm [resolvable:$true] %s587_s10 }
  0x41   : > { %1408 = dma.hbm_to_vmem [thread:$0]  (!%p1960_p9), %s588_s10, 2048, %s590_s21, %s528_s16, %s2298_s9, %s2298_s9, %s2297_s8  }
  0x45   : > { %1707 = dma.done.wait (%p298_p1), [#allocation3], 2048  }
  0x46   : > { %1709 = vsyncadd (%p298_p1), [#allocation3], 4294965248 }
  0x47   : > { %1711 = dma.done.wait (%p298_p1), [#allocation6], 2048  }
  0x48   : > { %1713 = vsyncadd (%p298_p1), [#allocation6], 4294965248  ;;  %s619_s11 = sand.u32 1, %s1881_s26   ;;  %s2007_s15 = sand.u32 1, %s1728_s19  }
  0x49   : > { %s1351_s21 = sshll.u32 %s2007_s15, 7  ;;  %s620_s23 = scalar_lea.sflag [#allocation3], %s619_s11 }
  0x4a   : > { %s2010_s24 = scalar_lea.vmem [#allocation7], %s1351_s21 }
  0x4b   : > { %1715 = dma.done.wait (%p1890_p4), %s620_s23, 6144  }
  0x4c   : > { %1717 = vsyncadd (%p1890_p4), %s620_s23, 4294961152  ;;  %s1354_s27 = sshll.u32 %s2007_s15, 3  ;;  %p731_p1 = scmp.lt.s32.totalorder %s1740_s22, 1 }
  0x4d   : > { %s2301_s18 = sld [smem:[#allocation33_spill]]  ;;  %s2054_s25 = scalar_lea.vmem [#allocation8], %s1351_s21 }
  0x4e   : > { %s2019_s30 = scalar_select %p731_p1, %s1740_s22, 1 }
  0x4f   : > { %s2302_s29 = sld [smem:[#allocation32_spill]]  ;;  %s2056_s2 = scalar_lea.vmem [#allocation9], %s1351_s21 }
  0x50   : > { %s2022_s26 = smul.u32 24, %s2019_s30  ;;  %s2303_s13 = sld [smem:[#allocation34_spill]] }
  0x51   : > { %s1375_s8 = smul.u32 3, %s2019_s30  ;;  %s2304_s6 = sld [smem:[#allocation35_spill]] }
  0x52   : > { %s735_s0 = scalar_lea.vmem %s2234_s5, %s2022_s26  ;;  %s2058_s17 = scalar_lea.vmem [#allocation10], %s1354_s27 }
  0x53   : > { %s744_s10 = scalar_lea.vmem %s2301_s18, %s2022_s26  ;;  %s2305_s7 = sld [smem:[#allocation18_spill]] }
  0x55   : > { %s2044_s16 = scalar_lea.vmem %s2302_s29, %s1375_s8 }
  0x56   : > { %s749_s20 = scalar_lea.vmem %s2303_s13, %s2022_s26 }
  0x57   : > { %s754_s1 = scalar_lea.vmem %s2304_s6, %s2022_s26 }
  0x59   : > { %p1359_p4 = scmp.ne.s32.totalorder %s2305_s7, 0 }
  0x5a   : > { %s2306_s19 = sld [smem:[#allocation27_spill]] (!%p1359_p4) }
  0x5b   : > { %765 = sbr.rel (%p1359_p4) target bundleno = 387 (0x183), region = 104  ;;  %s2307_s28 = sld [smem:[#allocation29_spill]] (!%p1359_p4) }
  0x5c   : > { %s2308_s18 = sld [smem:[#allocation31_spill]] (!%p1359_p4) }
  0x60   : > { %v782_v0 = vld [vmem:[#allocation2 + $0x78] sm:$0xff]  ;;  %v781_v1 = vld [vmem:[#allocation2 + $0x70] sm:$0xff]  ;;  %v780_v2 = vld [vmem:[#allocation2 + $0x68] sm:$0xff] }
  0x61   : > { %787 = vmatpush.msra.mxu0 %v782_v0  ;;  %v779_v3 = vld [vmem:[#allocation2 + $0x60] sm:$0xff]  ;;  %v823_v4 = vld [vmem:[#allocation5 + $0x78] sm:$0xff]  ;;  %v822_v6 = vld [vmem:[#allocation5 + $0x70] sm:$0xff] }
  0x62   : > { %v778_v5 = vld [vmem:[#allocation2 + $0x58] sm:$0xff]  ;;  %828 = vmatpush.msra.mxu1 %v823_v4  ;;  %v821_v7 = vld [vmem:[#allocation5 + $0x68] sm:$0xff]  ;;  %v777_v8 = vld [vmem:[#allocation2 + $0x50] sm:$0xff] }
  0x63   : > { %788 = vmatpush.msra.mxu0 %v781_v1  ;;  %v820_v9 = vld [vmem:[#allocation5 + $0x60] sm:$0xff]  ;;  %v776_v10 = vld [vmem:[#allocation2 + $0x48] sm:$0xff]  ;;  %v819_v11 = vld [vmem:[#allocation5 + $0x58] sm:$0xff] }
  0x64   : > { %829 = vmatpush.msra.mxu1 %v822_v6  ;;  %v775_v12 = vld [vmem:[#allocation2 + $0x40] sm:$0xff]  ;;  %v818_v13 = vld [vmem:[#allocation5 + $0x50] sm:$0xff]  ;;  %v774_v14 = vld [vmem:[#allocation2 + $0x38] sm:$0xff] }
  0x65   : > { %789 = vmatpush.msra.mxu0 %v780_v2  ;;  %v817_v15 = vld [vmem:[#allocation5 + $0x48] sm:$0xff]  ;;  %v773_v16 = vld [vmem:[#allocation2 + $0x30] sm:$0xff]  ;;  %v816_v17 = vld [vmem:[#allocation5 + $0x40] sm:$0xff] }
  0x66   : > { %830 = vmatpush.msra.mxu1 %v821_v7  ;;  %v772_v18 = vld [vmem:[#allocation2 + $0x28] sm:$0xff]  ;;  %v815_v19 = vld [vmem:[#allocation5 + $0x38] sm:$0xff]  ;;  %v771_v20 = vld [vmem:[#allocation2 + $0x20] sm:$0xff] }
  0x67   : > { %790 = vmatpush.msra.mxu0 %v779_v3  ;;  %v814_v21 = vld [vmem:[#allocation5 + $0x30] sm:$0xff]  ;;  %v770_v22 = vld [vmem:[#allocation2 + $0x18] sm:$0xff]  ;;  %v813_v23 = vld [vmem:[#allocation5 + $0x28] sm:$0xff] }
  0x68   : > { %831 = vmatpush.msra.mxu1 %v820_v9  ;;  %v769_v24 = vld [vmem:[#allocation2 + $0x10] sm:$0xff]  ;;  %v812_v25 = vld [vmem:[#allocation5 + $0x20] sm:$0xff]  ;;  %v768_v26 = vld [vmem:[#allocation2 + $0x8] sm:$0xff] }
  0x69   : > { %791 = vmatpush.msra.mxu0 %v778_v5  ;;  %v811_v27 = vld [vmem:[#allocation5 + $0x18] sm:$0xff]  ;;  %v767_v28 = vld [vmem:[#allocation2] sm:$0xff]  ;;  %v810_v30 = vld [vmem:[#allocation5 + $0x10] sm:$0xff] }
  0x6a   : > { %832 = vmatpush.msra.mxu1 %v819_v11  ;;  %v766_v29 = vld [vmem:[%s2306_s19] sm:$0xff]  ;;  %v809_v31 = vld [vmem:[#allocation5 + $0x8] sm:$0xff] }
  0x6b   : > { %792 = vmatpush.msra.mxu0 %v777_v8  ;;  %v808_v32 = vld [vmem:[#allocation5] sm:$0xff] }
  0x6c   : > { %833 = vmatpush.msra.mxu1 %v818_v13  ;;  %v1489_v33 = vld [vmem:[%s2307_s28] ss:$0 sm:$0xff] }
  0x6d   : > { %793 = vmatpush.msra.mxu0 %v776_v10  ;;  %v1490_v37 = vld [vmem:[%s2308_s18] ss:$0 sm:$0xff] }
  0x6e   : > { %834 = vmatpush.msra.mxu1 %v817_v15 }
  0x6f   : > { %794 = vmatpush.msra.mxu0 %v775_v12 }
  0x70   : > { %835 = vmatpush.msra.mxu1 %v816_v17 }
  0x71   : > { %795 = vmatpush.msra.mxu0 %v774_v14 }
  0x72   : > { %836 = vmatpush.msra.mxu1 %v815_v19 }
  0x73   : > { %796 = vmatpush.msra.mxu0 %v773_v16 }
  0x74   : > { %837 = vmatpush.msra.mxu1 %v814_v21 }
  0x75   : > { %797 = vmatpush.msra.mxu0 %v772_v18 }
  0x76   : > { %838 = vmatpush.msra.mxu1 %v813_v23 }
  0x77   : > { %798 = vmatpush.msra.mxu0 %v771_v20 }
  0x78   : > { %839 = vmatpush.msra.mxu1 %v812_v25 }
  0x79   : > { %799 = vmatpush.msra.mxu0 %v770_v22 }
  0x7a   : > { %840 = vmatpush.msra.mxu1 %v811_v27 }
  0x7b   : > { %800 = vmatpush.msra.mxu0 %v769_v24 }
  0x7c   : > { %841 = vmatpush.msra.mxu1 %v810_v30 }
  0x7d   : > { %801 = vmatpush.msra.mxu0 %v768_v26 }
  0x7e   : > { %842 = vmatpush.msra.mxu1 %v809_v31 }
  0x7f   : > { %802 = vmatpush.msra.mxu0 %v767_v28 }
  0x80   : > { %803 = vmatmul.f32.vlgmr.msra.gmra.mxu0 %v766_v29  ;;  %843 = vmatpush.msra.mxu1 %v808_v32 }
  0xfd   : > { %v804_v34 = vpop.f32.mrf.mxu0 }
  0xfe   : > { %v805_v35 = vadd.f32 %v1489_v33, %v804_v34 }
 0x100   : > { %v807_v36 = vmax.f32 %v805_v35, 0.0 }
 0x102   : > { %844 = vmatmul.f32.vlgmr.msra.gmra.mxu1 %v807_v36 }
 0x17f   : > { %v845_v38 = vpop.f32.mrf.mxu1 }
 0x180   : > { %v846_v39 = vadd.f32 %v1490_v37, %v845_v38 }
 0x182   : > { %848 = vst [vmem:[%s2058_s17] sm:$0xff] %v846_v39 }
 0x183 PF: > { %s2309_s11 = sld [smem:[#allocation18_spill]]  ;;  %v853_v40 = vlaneseq  ;;  %v1758_v41 = vmov 0   ;;  %vm870_vm1 = vcmask 1043456   ;;  %v936_v53 = vld [vmem:[%s2054_s25 + $0x78] sm:$0xff]  ;;  %v935_v55 = vld [vmem:[%s2054_s25 + $0x70] sm:$0xff]  ;;  %v934_v57 = vld [vmem:[%s2054_s25 + $0x68] sm:$0xff] }
 0x184   : > { %1491 = vset.pattern.permute.xlu0 %v1758_v41  ;;  %1492 = vset.pattern.permute.xlu1 %v1758_v41  ;;  %v918_v54 = vld [vmem:[%s2010_s24 + $0x78] sm:$0xff]  ;;  %v917_v56 = vld [vmem:[%s2010_s24 + $0x70] sm:$0xff]  ;;  %v916_v58 = vld [vmem:[%s2010_s24 + $0x68] sm:$0xff]  ;;  %v1759_v13 = vmov 0.0   ;;  %vm866_vm3 = vcmask 64512   ;;  %s1368_s26 = sshll.u32 %s1740_s22, 3 }
 0x185   : > { %v2085_v44 = vshrl.u32 %v853_v40, 7  ;;  %957 = vmatpush.msra.mxu3 %v918_v54  ;;  %v933_v59 = vld [vmem:[%s2054_s25 + $0x60] sm:$0xff]  ;;  %v932_v61 = vld [vmem:[%s2054_s25 + $0x58] sm:$0xff]  ;;  %v931_v63 = vld [vmem:[%s2054_s25 + $0x50] sm:$0xff]  ;;  %v854_v11 = vand.u32 127, %v853_v40  ;;  %s2315_s9 = sld [smem:[#allocation39_spill]] }
 0x186   : > { %v915_v60 = vld [vmem:[%s2010_s24 + $0x60] sm:$0xff]  ;;  %v914_v62 = vld [vmem:[%s2010_s24 + $0x58] sm:$0xff]  ;;  %v913_v0 = vld [vmem:[%s2010_s24 + $0x50] sm:$0xff] }
 0x187   : > { %958 = vmatpush.msra.mxu3 %v917_v56  ;;  %v930_v1 = vld [vmem:[%s2054_s25 + $0x48] sm:$0xff]  ;;  %v929_v3 = vld [vmem:[%s2054_s25 + $0x40] sm:$0xff]  ;;  %v928_v5 = vld [vmem:[%s2054_s25 + $0x38] sm:$0xff] }
 0x188   : > { %v912_v2 = vld [vmem:[%s2010_s24 + $0x48] sm:$0xff]  ;;  %v911_v4 = vld [vmem:[%s2010_s24 + $0x40] sm:$0xff]  ;;  %v910_v6 = vld [vmem:[%s2010_s24 + $0x38] sm:$0xff] }
 0x189   : > { %s2072_s23 = sshll.u32 %s2309_s11, 3  ;;  %s983_s29 = scalar_lea.vmem %s2044_s16, %s2309_s11  ;;  %v2096_v46 = vld [vmem:[%s2058_s17] sm:$0xff]  ;;  %959 = vmatpush.msra.mxu3 %v916_v58  ;;  %v927_v7 = vld [vmem:[%s2054_s25 + $0x30] sm:$0xff]  ;;  %v924_v18 = vld [vmem:[%s2054_s25 + $0x18] sm:$0xff] }
 0x18a   : > { %s851_s7 = scalar_lea.vmem %s735_s0, %s2072_s23  ;;  %v2082_v42 = vld [vmem:[%s983_s29] ss:$0 sm:$0xff]  ;;  %s992_s19 = scalar_lea.vmem %s744_s10, %s2072_s23  ;;  %v862_v47 = vpack.c.bf16 %v2096_v46, %v2096_v46  ;;  %v909_v8 = vld [vmem:[%s2010_s24 + $0x30] sm:$0xff]  ;;  %v926_v9 = vld [vmem:[%s2054_s25 + $0x28] sm:$0xff] }
 0x18b   : > { %v852_v43 = vld [vmem:[%s851_s7] sm:$0xff]  ;;  %vm988_vm0 = vcmp.eq.s32.totalorder %v2085_v44, %v2082_v42  ;;  %960 = vmatpush.msra.mxu3 %v915_v60  ;;  %v908_v10 = vld [vmem:[%s2010_s24 + $0x28] sm:$0xff]  ;;  %v906_v19 = vld [vmem:[%s2010_s24 + $0x18] sm:$0xff]  ;;  %s919_s27 = scalar_lea.vmem %s754_s1, %s2072_s23  ;;  %s2312_s1 = scalar_lea.vmem %s2241_s12, %s2019_s30 }
 0x18c   : > { %856 = vperm.xlu0 %1491, %v852_v43   ;;  %v993_v45 = vld [vmem:[%s992_s19] sm:$0xff]  ;;  %v863_v48 = vunpack.c.l.bf16 %v862_v47  ;;  %v888_v52 = vsel %vm870_vm1, %v862_v47, 0  ;;  %v923_v20 = vld [vmem:[%s2054_s25 + $0x10] sm:$0xff]  ;;  %v922_v22 = vld [vmem:[%s2054_s25 + $0x8] sm:$0xff]  ;;  %v1364_v38 = vsel %vm988_vm0, 1.0, %v1759_v13  ;;  %s1080_s18 = scalar_lea.vmem %s749_s20, %s2072_s23  ;;  %s2314_s29 = scalar_lea.vmem %s2243_s14, %s2019_s30 }
 0x18d   : > { %897 = vmatpush.bf16.msra.mxu1 %v888_v52  ;;  %961 = vmatpush.msra.mxu3 %v914_v62  ;;  %v925_v16 = vld [vmem:[%s2054_s25 + $0x20] sm:$0xff]  ;;  %v905_v21 = vld [vmem:[%s2010_s24 + $0x10] sm:$0xff]  ;;  %v904_v23 = vld [vmem:[%s2010_s24 + $0x8] sm:$0xff]  ;;  %v991_v40 = vpack.c.bf16 %v1364_v38, %v1364_v38  ;;  %s1101_s7 = scalar_lea.hbm %s2315_s9, %s1368_s26  ;;  %s1103_s16 = sshll.u32 %s2058_s17, 4  ;;  %s1104_s16 = int_to_ptr.vmem [resolvable:$true] %s1103_s16 }
 0x18e   : > { %v864_v49 = vsub.f32 %v2096_v46, %v863_v48  ;;  %v907_v17 = vld [vmem:[%s2010_s24 + $0x20] sm:$0xff]  ;;  %v1054_v48 = vld [vmem:[%s2056_s2 + $0x78] sm:$0xff]  ;;  %v1053_v44 = vld [vmem:[%s2056_s2 + $0x70] sm:$0xff]  ;;  %s1105_s3 = sshll.u32 %s1101_s7, 4  ;;  %s1091_s30 = scalar_lea.sflag [#allocation4], %s2007_s15  ;;  %s1106_s3 = int_to_ptr.hbm [resolvable:$true] %s1105_s3 }
 0x18f   : > { %962 = vmatpush.msra.mxu3 %v913_v0  ;;  %v921_v24 = vld [vmem:[%s2054_s25] sm:$0xff]  ;;  %v1049_v52 = vld [vmem:[%s2056_s2 + $0x50] sm:$0xff]  ;;  %s1660_s13 = sshra.s32 %s1106_s3, 4  ;;  %s1666_s10 = scalar_lea.hbm %s2315_s9, 16  ;;  %s1661_s13 = int_to_ptr.hbm [resolvable:$true] %s1660_s13 }
 0x190   : > { %v865_v50 = vpack.c.bf16 %v864_v49, %v864_v49  ;;  %v903_v25 = vld [vmem:[%s2010_s24] sm:$0xff]  ;;  %v1052_v49 = vld [vmem:[%s2056_s2 + $0x68] sm:$0xff]  ;;  %v1045_v56 = vld [vmem:[%s2056_s2 + $0x30] sm:$0xff]  ;;  %s1662_s22 = scalar_lea.hbm %s1661_s13, 8  ;;  %p1667_p12 = scmp.lt.s32.totalorder %s1661_s13, %s2315_s9 }
 0x191   : > { %963 = vmatpush.msra.mxu3 %v912_v2  ;;  %v920_v26 = vld [vmem:[%s919_s27] sm:$0xff]  ;;  %v1041_v60 = vld [vmem:[%s2056_s2 + $0x10] sm:$0xff]  ;;  %p1663_p8 = scmp.ne.s32.totalorder %s1661_s13, %s1662_s22  ;;  %p1668_p13 = scmp.lt.s32.totalorder %s1666_s10, %s1662_s22 }
 0x192   : > { %v872_v51 = vsel %vm870_vm1, %v865_v50, 0  ;;  %v1494_v33 = vld [vmem:[%s2312_s1] ss:$0 sm:$0xff] }
 0x193   : > { %881 = vmatpush.bf16.msra.mxu2 %v872_v51  ;;  %964 = vmatpush.msra.mxu3 %v911_v4  ;;  %v1051_v50 = vld [vmem:[%s2056_s2 + $0x60] sm:$0xff]  ;;  %v1050_v51 = vld [vmem:[%s2056_s2 + $0x58] sm:$0xff]  ;;  %p1664_p10 = pnand %p1663_p8, %p1931_p0  ;;  %p1669_p3 = por %p1668_p13, %p1667_p12 }
 0x194   : > { %1035 = vperm.xlu0 %1491, %v993_v45   ;;  %v1047_v54 = vld [vmem:[%s2056_s2 + $0x40] sm:$0xff] }
 0x195   : > { %965 = vmatpush.msra.mxu3 %v910_v6  ;;  %v1043_v58 = vld [vmem:[%s2056_s2 + $0x20] sm:$0xff]  ;;  %p1665_p11 = pneg %p1664_p10 }
 0x196   : > { %v1039_v62 = vld [vmem:[%s2056_s2] sm:$0xff] }
 0x197   : > { %937 = vmatpush.msrb.mxu2 %v936_v53  ;;  %966 = vmatpush.msra.mxu3 %v909_v8  ;;  %v1048_v53 = vld [vmem:[%s2056_s2 + $0x48] sm:$0xff]  ;;  %p1670_p5 = pnand %p1669_p3, %p1665_p11 }
 0x199   : > { %938 = vmatpush.msrb.mxu2 %v935_v55  ;;  %967 = vmatpush.msra.mxu3 %v908_v10  ;;  %v1046_v55 = vld [vmem:[%s2056_s2 + $0x38] sm:$0xff] }
 0x19b   : > { %939 = vmatpush.msrb.mxu2 %v934_v57  ;;  %968 = vmatpush.msra.mxu3 %v907_v17  ;;  %v1044_v57 = vld [vmem:[%s2056_s2 + $0x28] sm:$0xff] }
 0x19d   : > { %940 = vmatpush.msrb.mxu2 %v933_v59  ;;  %969 = vmatpush.msra.mxu3 %v906_v19  ;;  %v1042_v59 = vld [vmem:[%s2056_s2 + $0x18] sm:$0xff] }
 0x19f   : > { %941 = vmatpush.msrb.mxu2 %v932_v61  ;;  %970 = vmatpush.msra.mxu3 %v905_v21  ;;  %v1040_v61 = vld [vmem:[%s2056_s2 + $0x8] sm:$0xff] }
 0x1a1   : > { %942 = vmatpush.msrb.mxu2 %v931_v63  ;;  %971 = vmatpush.msra.mxu3 %v904_v23  ;;  %v1081_v63 = vld [vmem:[%s1080_s18] sm:$0xff] }
 0x1a2   : > { %1084 = vperm.xlu1 %1492, %v1081_v63  }
 0x1a3   : > { %943 = vmatpush.msrb.mxu2 %v930_v1  ;;  %972 = vmatpush.msra.mxu3 %v903_v25 }
 0x1a5   : > { %944 = vmatpush.msrb.mxu2 %v929_v3 }
 0x1a7   : > { %945 = vmatpush.msrb.mxu2 %v928_v5 }
 0x1a9   : > { %946 = vmatpush.msrb.mxu2 %v927_v7  ;;  %v1495_v7 = vld [vmem:[%s2314_s29] ss:$0 sm:$0xff] }
 0x1ab   : > { %947 = vmatpush.msrb.mxu2 %v926_v9 }
 0x1ad   : > { %948 = vmatpush.msrb.mxu2 %v925_v16 }
 0x1af   : > { %949 = vmatpush.msrb.mxu2 %v924_v18 }
 0x1b1   : > { %950 = vmatpush.msrb.mxu2 %v923_v20 }
 0x1b3   : > { %951 = vmatpush.msrb.mxu2 %v922_v22 }
 0x1b5   : > { %952 = vmatpush.msrb.mxu2 %v921_v24 }
 0x1fe   : > { %v857_v12 = vpop.permute.xlu0 %856 }
 0x1ff   : > { %vm858_vm2 = vcmp.eq.s32.totalorder %v854_v11, %v857_v12 }
 0x200   : > { %v1361_v14 = vsel %vm858_vm2, 1.0, %v1759_v13 }
 0x201   : > { %v861_v15 = vpack.c.bf16 %v1361_v14, %v1361_v14 }
 0x203   : > { %1362 = vmatmul.msk.bf16.vlgmr.msra.gmra.mxu2 %vm866_vm3, %v861_v15  ;;  %1363 = vmatmul.msk.bf16.vlgmr.msra.gmra.mxu1 %vm866_vm3, %v861_v15 }
 0x206   : > { %v1036_v3 = vpop.permute.xlu0 %1035 }
 0x213   : > { %953 = vmatmul.f32.vlgmr.msrb.gmra.mxu2 %v920_v26 }
 0x214   : > { %v1085_v10 = vpop.permute.xlu1 %1084 }
 0x280   : > { %v899_v27 = vpop.f32.mrf.mxu1 }
 0x286   : > { %v883_v28 = vpop.f32.mrf.mxu2 }
 0x287   : > { %v900_v29 = vadd.f32 %v899_v27, %v883_v28 }
 0x288   : > { %v901_v30 = vpop.f32.mrf.mxu1 }
 0x289   : > { %973 = vmatmul.f32.vlgmr.msra.gmra.mxu3 %v900_v29 }
 0x28e   : > { %v885_v31 = vpop.f32.mrf.mxu2 }
 0x296   : > { %v954_v32 = vpop.f32.mrf.mxu2 }
 0x30c   : > { %v974_v34 = vpop.f32.mrf.mxu3 }
 0x30d   : > { %v975_v35 = vadd.f32 %v974_v34, %v954_v32 }
 0x30f   : > { %v981_v36 = vadd.f32 %v1494_v33, %v975_v35 }
 0x311   : > { %v982_v37 = vmax.f32 %v981_v36, 0.0 }
 0x313   : > { %v994_v39 = vpack.c.bf16 %v982_v37, %v982_v37 }
 0x315   : > { %v1018_v41 = vsel %vm870_vm1, %v994_v39, 0  ;;  %v995_v43 = vunpack.c.l.bf16 %v994_v39 }
 0x316   : > { %1027 = vmatpush.bf16.msrb.mxu1 %v1018_v41 }
 0x317   : > { %v996_v45 = vsub.f32 %v982_v37, %v995_v43 }
 0x319   : > { %v997_v47 = vpack.c.bf16 %v996_v45, %v996_v45  ;;  %1366 = vmatmul.msk.bf16.vlgmr.msrb.gmra.mxu1 %vm866_vm3, %v991_v40 }
 0x31b   : > { %v1002_v42 = vsel %vm870_vm1, %v997_v47, 0 }
 0x31c   : > { %1011 = vmatpush.bf16.msra.mxu0 %v1002_v42 }
 0x31f   : > { %1365 = vmatmul.msk.bf16.vlgmr.msra.gmra.mxu0 %vm866_vm3, %v991_v40 }
 0x320   : > { %1059 = vmatpush.msrb.mxu0 %v1054_v48 }
 0x322   : > { %1060 = vmatpush.msrb.mxu0 %v1053_v44 }
 0x324   : > { %1061 = vmatpush.msrb.mxu0 %v1052_v49 }
 0x326   : > { %1062 = vmatpush.msrb.mxu0 %v1051_v50 }
 0x328   : > { %1063 = vmatpush.msrb.mxu0 %v1050_v51 }
 0x32a   : > { %1064 = vmatpush.msrb.mxu0 %v1049_v52 }
 0x32c   : > { %1065 = vmatpush.msrb.mxu0 %v1048_v53 }
 0x32e   : > { %1066 = vmatpush.msrb.mxu0 %v1047_v54 }
 0x330   : > { %1067 = vmatpush.msrb.mxu0 %v1046_v55 }
 0x332   : > { %1068 = vmatpush.msrb.mxu0 %v1045_v56 }
 0x334   : > { %1069 = vmatpush.msrb.mxu0 %v1044_v57 }
 0x336   : > { %1070 = vmatpush.msrb.mxu0 %v1043_v58 }
 0x338   : > { %1071 = vmatpush.msrb.mxu0 %v1042_v59 }
 0x33a   : > { %1072 = vmatpush.msrb.mxu0 %v1041_v60 }
 0x33c   : > { %1073 = vmatpush.msrb.mxu0 %v1040_v61 }
 0x33e   : > { %1074 = vmatpush.msrb.mxu0 %v1039_v62 }
 0x396   : > { %v1029_v0 = vpop.f32.mrf.mxu1 }
 0x39c   : > { %v1013_v1 = vpop.f32.mrf.mxu0 }
 0x39d   : > { %v1030_v2 = vadd.f32 %v1029_v0, %v1013_v1 }
 0x39e   : > { %v1031_v4 = vpop.f32.mrf.mxu1 }
 0x39f   : > { %v1038_v5 = vmul.f32 %v1036_v3, %v1030_v2 }
 0x3a1   : > { %1075 = vmatmul.f32.vlgmr.msrb.gmra.mxu0 %v1038_v5 }
 0x3a4   : > { %v1015_v6 = vpop.f32.mrf.mxu0 }
 0x41e   : > { %v1076_v8 = vpop.f32.mrf.mxu0 }
 0x41f   : > { %v1077_v9 = vadd.f32 %v1495_v7, %v1076_v8 }
 0x421   : > { %v1079_v11 = vmax.f32 %v1077_v9, 0.0 }
 0x423   : > { %v1087_v12 = vmul.f32 %v1085_v10, %v1079_v11 }
 0x425   : > { %v1088_v13 = vadd.f32 %v1087_v12, %v2096_v46 }
 0x427   : > { %1089 = vst [vmem:[%s2058_s17] sm:$0xff] %v1088_v13 }
 0x428   : > { %1673 = shalt.err (!%p1670_p5)
}
 0x429   : > { %1390 = dma.vmem_to_hbm [thread:$0]  (%p1931_p0), %s1104_s16, 128, %s1106_s3, %s1091_s30  }
 0x42a PF: > { %s2317_s15 = sld [smem:[#allocation21_spill]] }
 0x42b   : > { %s2318_s17 = sld [smem:[#allocation15_spill]] }
 0x430   : > { %p1418_p7 = scmp.ge.s32.totalorder %s2317_s15, 2 }
 0x431   : > { %s1117_s8 = sand.u32 1, %s2318_s17  }
 0x432   : > { %p1410_p2 = pnand %p1418_p7, %p1895_p6  ;;  %s1118_s1 = scalar_lea.sflag [#allocation4], %s1117_s8 }
 0x434   : > { %p1411_p9 = pneg %p1410_p2 }
 0x436   : > { %1719 = dma.done.wait (%p1411_p9), %s1118_s1, 128  }
 0x437   : > { %1721 = vsyncadd (%p1411_p9), %s1118_s1, 4294967168  ;;  %s30_s25 = sadd.s32 1, %s2317_s15   ;;  %s2320_s18 = sld [smem:[#allocation16_spill]] }
 0x438   : > { %p27_p1 = scmp.ge.s32.totalorder %s30_s25, 8   ;;  %s2321_s19 = sld [smem:[#allocation17_spill]] }
 0x439   : > { %s2322_s20 = sld [smem:[#allocation26_spill]] }
 0x43a   : > { %s2323_s21 = sld [smem:[#allocation19_spill]]  ;;  %29 = sbr.rel (!%p27_p1) target bundleno = 21 (0x15), region = 184 }
 0x43b   : > { %s2324_s22 = sld [smem:[#allocation20_spill]] }
 0x43c   : > { %s2325_s23 = sld [smem:[#allocation23_spill]] }
 0x43d   : > { %s2326_s24 = sld [smem:[#allocation25_spill]] }
 0x43f   :  { %1124 = vsyncpa [#allocation3], 1 }
 0x440   :  { %1126 = vsyncpa [#allocation3 + $0x1], 1 }
 0x441   :  { %1127 = vsyncpa [#allocation6], 1 }
 0x442   :  { %1128 = vsyncpa [#allocation4], 1 }
 0x443   :  { %1130 = vsyncpa [#allocation4 + $0x1], 1 }

</bundles_post_ra>
